<compile_context>
chip_gen: v5e
topology: v5e:2x2
jax: 0.10.0
libtpu: 0.0.40
codegen_flags: <defaults>
</compile_context>

<pallas_src>
import jax
import jax.numpy as jnp
from jax.experimental import pallas as pl
from jax.experimental.pallas import tpu as pltpu


def _round_up(x, m):
    return ((x + m - 1) // m) * m


def _cdiv(a, b):
    return -(-a // b)


def _sublane_multiple(dtype):
    itemsize = jnp.dtype(dtype).itemsize
    if itemsize >= 4:
        return 8
    if itemsize == 2:
        return 16
    return 32


def _vmem_limit_bytes():
    # Leave ~1/8 headroom for compiler-internal scratch:
    # v7x (64 MiB) -> 56 MiB, v5e/v6e (128 MiB) -> 112 MiB.
    try:
        cap = pltpu.get_tpu_info().vmem_capacity_bytes
        return int(cap * 7 // 8)
    except Exception:
        return 48 * 1024 * 1024


def _largest_divisor_tile(total, cap, step=128):
    """Largest multiple of `step` <= cap that divides `total` (total % step == 0)."""
    t = min(cap, total)
    t -= t % step
    while t >= step:
        if total % t == 0:
            return t
        t -= step
    return step


# -------------------------- kernels --------------------------------------- #

def _classifier_kernel_single_k(x_ref, w_ref, b_ref, o_ref):
    # x_ref: [tm, K]  w_ref: [K, tn]  b_ref: [1, tn]  o_ref: [tm, tn]
    logits = jnp.dot(x_ref[...], w_ref[...], preferred_element_type=jnp.float32)
    logits = logits + b_ref[...].astype(jnp.float32)
    o_ref[...] = jax.nn.sigmoid(logits).astype(o_ref.dtype)


def _classifier_kernel_multi_k(x_ref, w_ref, b_ref, o_ref, acc_ref):
    # x_ref: [tm, tk]  w_ref: [tk, tn]  b_ref: [1, tn]  o_ref: [tm, tn]
    k = pl.program_id(2)

    @pl.when(k == 0)
    def _init():
        acc_ref[...] = jnp.zeros_like(acc_ref)

    acc_ref[...] += jnp.dot(
        x_ref[...], w_ref[...], preferred_element_type=jnp.float32
    )

    @pl.when(k == pl.num_programs(2) - 1)
    def _epilogue():
        logits = acc_ref[...] + b_ref[...].astype(jnp.float32)
        o_ref[...] = jax.nn.sigmoid(logits).astype(o_ref.dtype)


# -------------------------- host-side wrappers ----------------------------- #

def prepare_classifier_params(weight, bias, *, compute_dtype=None):
    """One-time parameter prep (call outside the hot path).

    weight: [F_out, F_in] (PyTorch layout); bias: [F_out].
    Returns (w_t_padded [K_pad, N_pad], bias_padded [1, N_pad]) with K_pad / N_pad
    rounded up to 128 only (no tile-size over-padding).
    """
    F_out, F_in = weight.shape
    K_pad = _round_up(F_in, 128)
    N_pad = _round_up(F_out, 128)
    w_t = jnp.pad(weight.T, ((0, K_pad - F_in), (0, N_pad - F_out)))
    if compute_dtype is not None:
        w_t = w_t.astype(compute_dtype)
    b2 = jnp.pad(bias.reshape(1, F_out), ((0, 0), (0, N_pad - F_out)))
    return w_t, b2


def classifier_forward(x, w_prepared, b_prepared, out_features, *,
                       compute_dtype=None, force_pallas=False):
    """x: [B, F_in]; w_prepared: [K_pad, N_pad]; b_prepared: [1, N_pad]."""
    B, F_in = x.shape
    K_pad, N_pad = w_prepared.shape
    out_dtype = x.dtype

    # Tiny problems: XLA fusion wins outright; skip the kernel unless forced.
    if not force_pallas and B * F_in * out_features < 1_000_000:
        w = w_prepared[:F_in, :out_features]
        b = b_prepared[0, :out_features]
        return jax.nn.sigmoid(jnp.dot(x, w) + b).astype(out_dtype)

    if compute_dtype is not None and x.dtype != jnp.dtype(compute_dtype):
        x = x.astype(compute_dtype)

    # --- Tile selection -----------------------------------------------------
    base_m = _sublane_multiple(x.dtype)

    # N: lane-dense; cover all of N_pad in one tile when small so x is streamed
    # from HBM exactly once (no re-fetch across an N grid).
    if N_pad <= 1024:
        tn = N_pad
    else:
        tn = _largest_divisor_tile(N_pad, 512)

    # K: single tile when it fits (no accumulator / K grid); otherwise the
    # largest 128-multiple divisor of K_pad up to 2048 (no over-padding).
    if K_pad <= 2048:
        tk = K_pad
    else:
        tk = _largest_divisor_tile(K_pad, 2048)

    # M: dtype-aware sublane rounding; keep M_pad tight, cap the tile at 512.
    if B <= 512:
        tm = _round_up(B, base_m)
    else:
        n_blocks = _cdiv(B, 512)
        tm = _round_up(_cdiv(B, n_blocks), base_m)
    M_pad = _round_up(B, tm)

    # v7x has 2 TensorCores: if the parallel (M, N) grid collapsed to a single
    # block, try halving tm to create 2 M blocks (nearly free, kernel is
    # HBM-bound).
    if (M_pad // tm) * (N_pad // tn) < 2:
        half = _round_up(max(tm // 2, 1), base_m)
        if half < tm and _round_up(B, half) // half >= 2:
            tm = half
            M_pad = _round_up(B, tm)

    x_p = x
    if (M_pad, K_pad) != (B, F_in):
        x_p = jnp.pad(x, ((0, M_pad - B), (0, K_pad - F_in)))

    grid_m = M_pad // tm
    grid_n = N_pad // tn
    grid_k = K_pad // tk

    # Advisory cost estimate for XLA's scheduler.
    bytes_accessed = (
        x_p.size * x_p.dtype.itemsize
        + w_prepared.size * w_prepared.dtype.itemsize
        + b_prepared.size * b_prepared.dtype.itemsize
        + M_pad * N_pad * jnp.dtype(out_dtype).itemsize
    )
    cost = pl.CostEstimate(
        flops=2 * M_pad * N_pad * K_pad,
        transcendentals=M_pad * N_pad,          # sigmoid exp
        bytes_accessed=bytes_accessed,
    )

    if grid_k == 1:
        kernel = _classifier_kernel_single_k
        grid = (grid_m, grid_n)
        in_specs = [
            pl.BlockSpec((tm, tk), lambda i, j: (i, 0)),   # x tile
            pl.BlockSpec((tk, tn), lambda i, j: (0, j)),   # W^T tile
            pl.BlockSpec((1, tn), lambda i, j: (0, j)),    # bias tile
        ]
        out_specs = pl.BlockSpec((tm, tn), lambda i, j: (i, j))
        scratch_shapes = []
        dim_sem = ("parallel", "parallel")
    else:
        kernel = _classifier_kernel_multi_k
        grid = (grid_m, grid_n, grid_k)
        in_specs = [
            pl.BlockSpec((tm, tk), lambda i, j, k: (i, k)),   # x tile
            pl.BlockSpec((tk, tn), lambda i, j, k: (k, j)),   # W^T tile
            pl.BlockSpec((1, tn), lambda i, j, k: (0, j)),    # bias tile
        ]
        out_specs = pl.BlockSpec((tm, tn), lambda i, j, k: (i, j))
        scratch_shapes = [pltpu.VMEM((tm, tn), jnp.float32)]
        dim_sem = ("parallel", "parallel", "arbitrary")

    out_padded = pl.pallas_call(
        kernel,
        out_shape=jax.ShapeDtypeStruct((M_pad, N_pad), out_dtype),
        grid_spec=pltpu.PrefetchScalarGridSpec(
            num_scalar_prefetch=0,
            grid=grid,
            in_specs=in_specs,
            out_specs=out_specs,
            scratch_shapes=scratch_shapes,
        ),
        compiler_params=pltpu.CompilerParams(
            dimension_semantics=dim_sem,
            vmem_limit_bytes=_vmem_limit_bytes(),
        ),
        cost_estimate=cost,
    )(x_p, w_prepared, b_prepared)

    # Slice padded rows / columns back off.
    return out_padded[:B, :out_features]


if __name__ == "__main__":
    # Small shapes consistent with the module: batch=2, in_features=32, out_features=8.
    key = jax.random.PRNGKey(0)
    k_x, k_w, k_b = jax.random.split(key, 3)

    B, F_in, F_out = 2, 32, 8
    x = jax.random.normal(k_x, (B, F_in), dtype=jnp.float32)
    bound = 1.0 / (F_in ** 0.5)
    weight = jax.random.uniform(k_w, (F_out, F_in), minval=-bound, maxval=bound,
                                dtype=jnp.float32)
    bias = jax.random.uniform(k_b, (F_out,), minval=-bound, maxval=bound,
                              dtype=jnp.float32)

    # One-time parameter prep (transpose + 128-pad) outside the hot path.
    w_prep, b_prep = prepare_classifier_params(weight, bias)

    # Force the Pallas path so the kernel itself compiles and runs on TPU
    # (at this size the wrapper would otherwise take the plain-XLA fast path).
    out = classifier_forward(x, w_prep, b_prep, F_out, force_pallas=True)
    out = jax.block_until_ready(out)

    # Reference check in plain JAX.
    ref = jax.nn.sigmoid(x @ weight.T + bias)
    assert out.shape == (B, F_out)
    assert jnp.allclose(out, ref, atol=1e-5, rtol=1e-5)

    print("KERNEL_OK")
</pallas_src>

<mosaic_0001>
module attributes {stable_mosaic.version = 11 : i64} {
  func.func @_classifier_kernel_single_k(%arg0: i32, %arg1: i32, %arg2: memref<8x128xf32, #tpu.memory_space<vmem>>, %arg3: memref<128x128xf32, #tpu.memory_space<vmem>>, %arg4: memref<1x128xf32, #tpu.memory_space<vmem>>, %arg5: memref<8x128xf32, #tpu.memory_space<vmem>>) attributes {dimension_semantics = [#tpu.dimension_semantics<parallel>, #tpu.dimension_semantics<parallel>], iteration_bounds = array<i64: 1, 1>, scalar_prefetch = 0 : i64, scratch_operands = 0 : i64, tpu.core_type = #tpu.core_type<tc>, window_params = [{transform_indices = @transform_0, window_bounds = array<i64: 8, 128>}, {transform_indices = @transform_1, window_bounds = array<i64: 128, 128>}, {transform_indices = @transform_2, window_bounds = array<i64: 1, 128>}, {transform_indices = @transform_3, window_bounds = array<i64: 8, 128>}]} {
    %c0 = arith.constant 0 : index
    %c0_0 = arith.constant 0 : index
    %0 = vector.load %arg2[%c0, %c0_0] : memref<8x128xf32, #tpu.memory_space<vmem>>, vector<8x128xf32>
    %c0_1 = arith.constant 0 : index
    %c0_2 = arith.constant 0 : index
    %1 = vector.load %arg3[%c0_1, %c0_2] : memref<128x128xf32, #tpu.memory_space<vmem>>, vector<128x128xf32>
    %cst = arith.constant dense<0.000000e+00> : vector<8x128xf32>
    %2 = tpu.matmul %0, %1, %cst {dimension_numbers = #tpu.dot_dimension_numbers<[1], [0], [0], [1], [0, 0, 1, 1], [], []>} : vector<8x128xf32>, vector<128x128xf32>, vector<8x128xf32> -> vector<8x128xf32>
    %c0_3 = arith.constant 0 : index
    %c0_4 = arith.constant 0 : index
    %3 = vector.load %arg4[%c0_3, %c0_4] : memref<1x128xf32, #tpu.memory_space<vmem>>, vector<1x128xf32>
    %4 = vector.broadcast %3 : vector<1x128xf32> to vector<8x128xf32>
    %5 = arith.addf %2, %4 : vector<8x128xf32>
    %6 = arith.negf %5 : vector<8x128xf32>
    %7 = math.exp %6 : vector<8x128xf32>
    %cst_5 = arith.constant 1.000000e+00 : f32
    %8 = vector.broadcast %cst_5 : f32 to vector<8x128xf32>
    %9 = arith.addf %8, %7 : vector<8x128xf32>
    %10 = arith.divf %8, %9 : vector<8x128xf32>
    %c0_6 = arith.constant 0 : index
    %c0_7 = arith.constant 0 : index
    %11 = vector.load %arg5[%c0_6, %c0_7] : memref<8x128xf32, #tpu.memory_space<vmem>>, vector<8x128xf32>
    tpu.vector_store %arg5[%c0_6, %c0_7], %10 {strides = array<i32>} : memref<8x128xf32, #tpu.memory_space<vmem>>, vector<8x128xf32>,
    return
  }
  func.func @transform_0(%arg0: i32, %arg1: i32) -> (i32, i32) {
    %c0_i32 = arith.constant 0 : i32
    %c0_i32_0 = arith.constant 0 : i32
    return %arg0, %c0_i32 : i32, i32
  }
  func.func @transform_1(%arg0: i32, %arg1: i32) -> (i32, i32) {
    %c0_i32 = arith.constant 0 : i32
    %c0_i32_0 = arith.constant 0 : i32
    return %c0_i32, %arg1 : i32, i32
  }
  func.func @transform_2(%arg0: i32, %arg1: i32) -> (i32, i32) {
    %c0_i32 = arith.constant 0 : i32
    %c0_i32_0 = arith.constant 0 : i32
    return %c0_i32, %arg1 : i32, i32
  }
  func.func @transform_3(%arg0: i32, %arg1: i32) -> (i32, i32) {
    %c0_i32 = arith.constant 0 : i32
    return %arg0, %arg1 : i32, i32
  }
}

</mosaic_0001>

<bundles_post_ra>
// kernel: tpu_custom_call.1
= control target key start
LH: loop header
LB: loop body
LE: loop exit
PB: predicated region body
PF: predicated region fallthrough
CT: control target
= control target key end

     0   :  { %8 = vsyncpa [#allocation3], 0  ;;  %s250_s0 = inlined_call_operand.hbm [shape: f32[8,128], index: 0, kind: input, shape index: {}]   ;;  %s251_s1 = inlined_call_operand.hbm [shape: f32[128,128], index: 1, kind: input, shape index: {}]   ;;  %s252_s2 = inlined_call_operand.vmem [shape: f32[1,128], index: 2, kind: input, shape index: {}]   ;;  %s253_s3 = inlined_call_operand.hbm [shape: f32[8,128], index: 3, kind: output, shape index: {}]  }
   0x1   :  { %9 = vsyncpa [#allocation6], 0 }
   0x2   :  { %10 = vsyncpa [#allocation4], 0  ;;  %s16_s14 = sshll.u32 %s250_s0, 4  ;;  %s213_s15 = smov [#allocation2]   ;;  %s17_s14 = int_to_ptr.hbm [resolvable:$true] %s16_s14 }
   0x3   :  { %s18_s16 = sshll.u32 %s213_s15, 4  ;;  %s26_s19 = sshll.u32 %s251_s1, 4  ;;  %s19_s16 = int_to_ptr.vmem [resolvable:$true] %s18_s16  ;;  %s27_s19 = int_to_ptr.hbm [resolvable:$true] %s26_s19 }
   0x4   :  { %21 = dma.hbm_to_vmem [thread:$0]  %s17_s14, 128, %s19_s16, [#allocation3]  }
   0x5   :  { %s214_s20 = smov [#allocation5]   ;;  %s215_s22 = smov 128  }
   0x6   :  { %s28_s21 = sshll.u32 %s214_s20, 4  ;;  %s216_s23 = smov 8   ;;  %s29_s21 = int_to_ptr.vmem [resolvable:$true] %s28_s21 }
   0x7   :  { %34 = dma.hbm_to_vmem [thread:$0]  %s27_s19, 2048, %s29_s21, [#allocation6], %s215_s22, %s215_s22, %s216_s23  }
   0x8   :  { %207 = dma.done.wait [#allocation3], 128  }
   0x9   :  { %208 = vsyncadd [#allocation3], 4294967168 }
   0xa   :  { %209 = dma.done.wait [#allocation6], 2048  }
   0xb   :  { %210 = vsyncadd [#allocation6], 4294965248  ;;  %v61_v0 = vld [vmem:[#allocation5 + $0x78] sm:$0xff]  ;;  %v60_v1 = vld [vmem:[#allocation5 + $0x70] sm:$0xff]  ;;  %s217_s24 = smov [#allocation7]  }
   0xc   :  { %66 = vmatpush.msra.mxu0 %v61_v0  ;;  %v59_v2 = vld [vmem:[#allocation5 + $0x68] sm:$0xff]  ;;  %v58_v3 = vld [vmem:[#allocation5 + $0x60] sm:$0xff]  ;;  %v57_v4 = vld [vmem:[#allocation5 + $0x58] sm:$0xff]  ;;  %s111_s25 = sshll.u32 %s217_s24, 4  ;;  %s112_s25 = int_to_ptr.vmem [resolvable:$true] %s111_s25 }
   0xd   :  { %v56_v5 = vld [vmem:[#allocation5 + $0x50] sm:$0xff]  ;;  %v55_v6 = vld [vmem:[#allocation5 + $0x48] sm:$0xff]  ;;  %v54_v7 = vld [vmem:[#allocation5 + $0x40] sm:$0xff] }
   0xe   :  { %67 = vmatpush.msra.mxu0 %v60_v1  ;;  %v53_v8 = vld [vmem:[#allocation5 + $0x38] sm:$0xff]  ;;  %v52_v9 = vld [vmem:[#allocation5 + $0x30] sm:$0xff]  ;;  %v51_v10 = vld [vmem:[#allocation5 + $0x28] sm:$0xff] }
   0xf   :  { %v50_v11 = vld [vmem:[#allocation5 + $0x20] sm:$0xff]  ;;  %v49_v12 = vld [vmem:[#allocation5 + $0x18] sm:$0xff]  ;;  %v48_v13 = vld [vmem:[#allocation5 + $0x10] sm:$0xff] }
  0x10   :  { %68 = vmatpush.msra.mxu0 %v59_v2  ;;  %v47_v14 = vld [vmem:[#allocation5 + $0x8] sm:$0xff]  ;;  %v46_v15 = vld [vmem:[#allocation5] sm:$0xff]  ;;  %v45_v16 = vld [vmem:[#allocation2] sm:$0xff] }
  0x11   :  { %v130_v17 = vld [vmem:[%s252_s2] ss:$0 sm:$0xff]  ;;  %s113_s2 = sshll.u32 %s253_s3, 4  ;;  %s114_s2 = int_to_ptr.hbm [resolvable:$true] %s113_s2 }
  0x12   :  { %69 = vmatpush.msra.mxu0 %v58_v3 }
  0x14   :  { %70 = vmatpush.msra.mxu0 %v57_v4 }
  0x16   :  { %71 = vmatpush.msra.mxu0 %v56_v5 }
  0x18   :  { %72 = vmatpush.msra.mxu0 %v55_v6 }
  0x1a   :  { %73 = vmatpush.msra.mxu0 %v54_v7 }
  0x1c   :  { %74 = vmatpush.msra.mxu0 %v53_v8 }
  0x1e   :  { %75 = vmatpush.msra.mxu0 %v52_v9 }
  0x20   :  { %76 = vmatpush.msra.mxu0 %v51_v10 }
  0x22   :  { %77 = vmatpush.msra.mxu0 %v50_v11 }
  0x24   :  { %78 = vmatpush.msra.mxu0 %v49_v12 }
  0x26   :  { %79 = vmatpush.msra.mxu0 %v48_v13 }
  0x28   :  { %80 = vmatpush.msra.mxu0 %v47_v14 }
  0x2a   :  { %81 = vmatpush.msra.mxu0 %v46_v15 }
  0x2b   :  { %82 = vmatmul.f32.vlgmr.msra.gmra.mxu0 %v45_v16 }
  0xa8   :  { %v83_v18 = vpop.f32.mrf.mxu0 }
  0xa9   :  { %v84_v19 = vadd.f32 %v130_v17, %v83_v18 }
  0xab   :  { %v124_v20 = vmul.f32 -1.442695, %v84_v19 }
  0xad   :  { %131 = vpow2.f32 %v124_v20 }
  0xb3   :  { %v132_v21 = vpop.eup %131 }
  0xb4   :  { %v89_v22 = vadd.f32 1.0, %v132_v21 }
  0xb6   :  { %133 = vrcp.f32 %v89_v22  ;;  %v101_v26 = vand.u32 2147483648, %v89_v22  ;;  %v99_v28 = vand.u32 2147483647, %v89_v22  ;;  %vm95_vm1 = vweird.f32 %v89_v22 }
  0xb8   :  { %v102_v30 = vor.u32 1.1754944e-38, %v101_v26  ;;  %vm100_vm3 = vcmp.eq.f32.partialorder %v99_v28, 8.507059e+37 }
  0xbc   :  { %v134_v23 = vpop.eup %133 }
  0xbd   :  { %v91_v24 = vmul.f32 %v134_v23, %v89_v22  ;;  %vm96_vm0 = vweird.f32 %v134_v23 }
  0xbe   :  { %vm97_vm2 = vmor %vm95_vm1, %vm96_vm0 }
  0xbf   :  { %v92_v25 = vsub.f32 1.0, %v91_v24 }
  0xc1   :  { %v93_v27 = vmul.f32 %v134_v23, %v92_v25 }
  0xc3   :  { %v94_v29 = vadd.f32 %v134_v23, %v93_v27 }
  0xc5   :  { %v98_v31 = vsel %vm97_vm2, %v134_v23, %v94_v29 }
  0xc6   :  { %v103_v32 = vsel %vm100_vm3, %v102_v30, %v98_v31 }
  0xc7   :  { %105 = vst [vmem:[#allocation7] sm:$0xff] %v103_v32 }
  0xc8   :  { %116 = dma.vmem_to_hbm [thread:$0]  %s112_s25, 128, %s114_s2, [#allocation4]  }
  0xc9   :  { %211 = dma.done.wait [#allocation4], 128  }
  0xca   :  { %212 = vsyncadd [#allocation4], 4294967168 }
  0xcb   :  { %121 = vsyncpa [#allocation3], 1 }
  0xcc   :  { %122 = vsyncpa [#allocation6], 1 }
  0xcd   :  { %123 = vsyncpa [#allocation4], 1 }

</bundles_post_ra>
